<compile_context>
chip_gen: v7x
topology: tpu7x:2x2x1
jax: 0.10.0
libtpu: 0.0.40
codegen_flags: <defaults>
</compile_context>

<pallas_src>
import functools

import jax
import jax.numpy as jnp
import numpy as np
from jax import lax
from jax.experimental import pallas as pl
from jax.experimental.pallas import tpu as pltpu

_TAPS = tuple((dh, dw) for dh in (-1, 0, 1) for dw in (-1, 0, 1))


def _resnet_block_kernel(rs_ref, mask_ref, x_ref, w0_ref, b0_ref, w1_ref, b1_ref,
                         o_ref, xpad_ref, ypad_ref, p0_ref, p1_ref, *, H, W):
    # rs_ref  : (1, 1) f32 in SMEM          -- res_scale
    # mask_ref: (9, H*W) f32                -- 0/1 border-validity mask per 3x3 tap
    # x_ref   : (1, Cin, H*W)               -- input (also the skip branch)
    # w0_ref  : (Cmid, 9*Cin), b0_ref: (Cmid, 1)
    # w1_ref  : (Cout, 9*Cmid), b1_ref: (Cout, 1)
    # o_ref   : (1, Cout, H*W)
    # xpad/ypad: (C, H*W + 2*(W+1)) VMEM    -- flat, zero-padded feature maps
    # p0/p1   : (9*C, H*W) VMEM             -- im2col patch matrices
    HW = H * W
    PAD = W + 1
    masks = mask_ref[...]                                    # (9, HW)

    def conv3x3(feat, pad_ref, patch_ref, wmat_ref, b_ref):
        # feat: (C, HW) f32. Build im2col patches in VMEM, then one MXU dot.
        C = feat.shape[0]
        pad_ref[...] = jnp.zeros_like(pad_ref)               # zero halo => 'zero' padding
        pad_ref[:, PAD:PAD + HW] = feat
        for t, (dh, dw) in enumerate(_TAPS):
            start = PAD + dh * W + dw                        # static lane offset
            shifted = pad_ref[:, start:start + HW]           # (C, HW) lane-shifted view
            patch_ref[t * C:(t + 1) * C, :] = shifted * masks[t:t + 1, :]
        # (Cout', 9*C) @ (9*C, HW) -> (Cout', HW), f32 accumulation on the MXU.
        return jnp.dot(wmat_ref[...], patch_ref[...],
                       preferred_element_type=jnp.float32) + b_ref[...]

    x = x_ref[0].astype(jnp.float32)                         # (Cin, HW)
    y = jnp.maximum(conv3x3(x, xpad_ref, p0_ref, w0_ref, b0_ref), 0.0)  # conv0 -> ReLU (CNA)
    r = conv3x3(y, ypad_ref, p1_ref, w1_ref, b1_ref)                    # conv1 (no act/norm)
    o_ref[0] = (x + rs_ref[0, 0] * r).astype(o_ref.dtype)    # x + res_scale * res


def _border_masks(H, W):
    # mask[t, h*W + w] = 1.0 iff the (dh, dw) neighbour of (h, w) is inside the image.
    h = np.repeat(np.arange(H), W)
    w = np.tile(np.arange(W), H)
    rows = []
    for dh, dw in _TAPS:
        valid = (h + dh >= 0) & (h + dh < H) & (w + dw >= 0) & (w + dw < W)
        rows.append(valid.astype(np.float32))
    return jnp.asarray(np.stack(rows, axis=0))               # (9, H*W)


def resnet_block_forward(x_nchw, params, res_scale=1.0):
    """ResNetBlock forward (mode='CNA', norm=None, act='relu', pad_type='zero').

    x_nchw : (N, C, H, W) float32 (PyTorch layout)
    params : w0 (Cmid, Cin, 3, 3), b0 (Cmid,), w1 (Cout, Cmid, 3, 3), b1 (Cout,)  [OIHW]
    """
    N, Cin, H, W = x_nchw.shape
    Cmid = params["w0"].shape[0]
    Cout = params["w1"].shape[0]
    assert Cin == Cout, "residual add requires in_nc == out_nc"
    HW = H * W
    HWP = HW + 2 * (W + 1)

    # Free contiguous reshape: lane axis becomes H*W (lane-dense); no transposes, no pads.
    x_flat = x_nchw.reshape(N, Cin, HW)
    # OIHW -> (Cout, kh, kw, Cin) -> (Cout, 9*Cin): taps folded into the contraction dim.
    w0m = jnp.transpose(params["w0"], (0, 2, 3, 1)).reshape(Cmid, 9 * Cin)
    w1m = jnp.transpose(params["w1"], (0, 2, 3, 1)).reshape(Cout, 9 * Cmid)
    b0 = params["b0"].reshape(Cmid, 1)
    b1 = params["b1"].reshape(Cout, 1)
    rs = jnp.full((1, 1), res_scale, jnp.float32)
    masks = _border_masks(H, W)

    kernel = functools.partial(_resnet_block_kernel, H=H, W=W)
    out_flat = pl.pallas_call(
        kernel,
        out_shape=jax.ShapeDtypeStruct((N, Cout, HW), x_nchw.dtype),
        grid_spec=pltpu.PrefetchScalarGridSpec(
            num_scalar_prefetch=0,
            grid=(N,),
            in_specs=[
                pl.BlockSpec(memory_space=pltpu.MemorySpace.SMEM),   # res_scale scalar
                pl.BlockSpec((9, HW), lambda n: (0, 0)),             # border masks
                pl.BlockSpec((1, Cin, HW), lambda n: (n, 0, 0)),     # x (and skip branch)
                pl.BlockSpec((Cmid, 9 * Cin), lambda n: (0, 0)),     # w0 (taps folded)
                pl.BlockSpec((Cmid, 1), lambda n: (0, 0)),           # b0
                pl.BlockSpec((Cout, 9 * Cmid), lambda n: (0, 0)),    # w1 (taps folded)
                pl.BlockSpec((Cout, 1), lambda n: (0, 0)),           # b1
            ],
            out_specs=pl.BlockSpec((1, Cout, HW), lambda n: (n, 0, 0)),
            scratch_shapes=[
                pltpu.VMEM((Cin, HWP), jnp.float32),                 # flat-padded x
                pltpu.VMEM((Cmid, HWP), jnp.float32),                # flat-padded relu(conv0)
                pltpu.VMEM((9 * Cin, HW), jnp.float32),              # im2col patches, conv0
                pltpu.VMEM((9 * Cmid, HW), jnp.float32),             # im2col patches, conv1
            ],
        ),
        compiler_params=pltpu.CompilerParams(
            dimension_semantics=("parallel",)),
    )(rs, masks, x_flat, w0m, b0, w1m, b1)
    return out_flat.reshape(N, Cout, H, W)


def init_params(key, in_nc, mid_nc, out_nc):
    k0, k1, k2, k3 = jax.random.split(key, 4)
    s0 = 1.0 / (3 * 3 * in_nc) ** 0.5
    s1 = 1.0 / (3 * 3 * mid_nc) ** 0.5
    return {
        "w0": jax.random.uniform(k0, (mid_nc, in_nc, 3, 3), jnp.float32, -s0, s0),
        "b0": jax.random.uniform(k1, (mid_nc,), jnp.float32, -s0, s0),
        "w1": jax.random.uniform(k2, (out_nc, mid_nc, 3, 3), jnp.float32, -s1, s1),
        "b1": jax.random.uniform(k3, (out_nc,), jnp.float32, -s1, s1),
    }


def _reference_forward(x_nchw, params, res_scale=1.0):
    # Pure-JAX reference (lax.conv, NCHW/OIHW) for correctness check.
    dn = ("NCHW", "OIHW", "NCHW")
    y = lax.conv_general_dilated(x_nchw, params["w0"], (1, 1), "SAME",
                                 dimension_numbers=dn)
    y = jnp.maximum(y + params["b0"][None, :, None, None], 0.0)
    r = lax.conv_general_dilated(y, params["w1"], (1, 1), "SAME",
                                 dimension_numbers=dn)
    r = r + params["b1"][None, :, None, None]
    return x_nchw + res_scale * r


if __name__ == "__main__":
    key = jax.random.PRNGKey(0)
    kx, kp = jax.random.split(key)

    N, C, H, W = 2, 4, 16, 16        # in_nc = mid_nc = out_nc (residual needs in_nc == out_nc)
    res_scale = 1.0

    x = jax.random.normal(kx, (N, C, H, W), jnp.float32)
    params = init_params(kp, C, C, C)

    fwd = jax.jit(resnet_block_forward)
    out = jax.block_until_ready(fwd(x, params, res_scale))

    ref = _reference_forward(x, params, res_scale)
    assert out.shape == (N, C, H, W)
    # Tolerance allows for MXU accumulation-order differences vs. the XLA conv.
    assert jnp.allclose(out, ref, atol=1e-3, rtol=1e-3), "mismatch vs JAX reference"

    print("KERNEL_OK")
</pallas_src>

<mosaic_0001>
module attributes {stable_mosaic.version = 11 : i64} {
  func.func @_resnet_block_kernel(%arg0: i32, %arg1: memref<1x1xf32, #tpu.memory_space<smem>>, %arg2: memref<9x256xf32, #tpu.memory_space<vmem>>, %arg3: memref<1x4x256xf32, #tpu.memory_space<vmem>>, %arg4: memref<4x36xf32, #tpu.memory_space<vmem>>, %arg5: memref<4x1xf32, #tpu.memory_space<vmem>>, %arg6: memref<4x36xf32, #tpu.memory_space<vmem>>, %arg7: memref<4x1xf32, #tpu.memory_space<vmem>>, %arg8: memref<1x4x256xf32, #tpu.memory_space<vmem>>, %arg9: memref<4x290xf32, #tpu.memory_space<vmem>>, %arg10: memref<4x290xf32, #tpu.memory_space<vmem>>, %arg11: memref<36x256xf32, #tpu.memory_space<vmem>>, %arg12: memref<36x256xf32, #tpu.memory_space<vmem>>) attributes {dimension_semantics = [#tpu.dimension_semantics<parallel>], iteration_bounds = array<i64: 2>, scalar_prefetch = 0 : i64, scratch_operands = 4 : i64, tpu.core_type = #tpu.core_type<tc>, window_params = [{transform_indices = @transform_0, window_bounds = array<i64: 1, 1>}, {pipeline_mode = #tpu.pipeline_mode<synchronous>, transform_indices = @transform_1, window_bounds = array<i64: 9, 256>}, {transform_indices = @transform_2, window_bounds = array<i64: 1, 4, 256>}, {pipeline_mode = #tpu.pipeline_mode<synchronous>, transform_indices = @transform_3, window_bounds = array<i64: 4, 36>}, {pipeline_mode = #tpu.pipeline_mode<synchronous>, transform_indices = @transform_4, window_bounds = array<i64: 4, 1>}, {pipeline_mode = #tpu.pipeline_mode<synchronous>, transform_indices = @transform_5, window_bounds = array<i64: 4, 36>}, {pipeline_mode = #tpu.pipeline_mode<synchronous>, transform_indices = @transform_6, window_bounds = array<i64: 4, 1>}, {transform_indices = @transform_7, window_bounds = array<i64: 1, 4, 256>}]} {
    %c0 = arith.constant 0 : index
    %c0_0 = arith.constant 0 : index
    %0 = vector.load %arg2[%c0, %c0_0] : memref<9x256xf32, #tpu.memory_space<vmem>>, vector<9x256xf32>
    %c0_1 = arith.constant 0 : index
    %c0_2 = arith.constant 0 : index
    %c0_3 = arith.constant 0 : index
    %1 = vector.load %arg3[%c0_1, %c0_2, %c0_3] : memref<1x4x256xf32, #tpu.memory_space<vmem>>, vector<1x4x256xf32>
    %2 = vector.shape_cast %1 : vector<1x4x256xf32> to vector<4x256xf32>
    %cst = arith.constant 0.000000e+00 : f32
    %3 = vector.broadcast %cst : f32 to vector<4x290xf32>
    %c0_4 = arith.constant 0 : index
    %c0_5 = arith.constant 0 : index
    %4 = vector.load %arg9[%c0_4, %c0_5] : memref<4x290xf32, #tpu.memory_space<vmem>>, vector<4x290xf32>
    tpu.vector_store %arg9[%c0_4, %c0_5], %3 {strides = array<i32>} : memref<4x290xf32, #tpu.memory_space<vmem>>, vector<4x290xf32>,
    %c0_6 = arith.constant 0 : index
    %c17 = arith.constant 17 : index
    %5 = vector.load %arg9[%c0_6, %c17] : memref<4x290xf32, #tpu.memory_space<vmem>>, vector<4x256xf32>
    tpu.vector_store %arg9[%c0_6, %c17], %2 {strides = array<i32>} : memref<4x290xf32, #tpu.memory_space<vmem>>, vector<4x256xf32>,
    %c0_7 = arith.constant 0 : index
    %c0_8 = arith.constant 0 : index
    %6 = vector.load %arg9[%c0_7, %c0_8] : memref<4x290xf32, #tpu.memory_space<vmem>>, vector<4x256xf32>
    %7 = vector.extract_strided_slice %0 {offsets = [0, 0], sizes = [1, 256], strides = [1, 1]} : vector<9x256xf32> to vector<1x256xf32>
    %8 = vector.broadcast %7 : vector<1x256xf32> to vector<4x256xf32>
    %9 = arith.mulf %6, %8 : vector<4x256xf32>
    %c0_9 = arith.constant 0 : index
    %c0_10 = arith.constant 0 : index
    %10 = vector.load %arg11[%c0_9, %c0_10] : memref<36x256xf32, #tpu.memory_space<vmem>>, vector<4x256xf32>
    tpu.vector_store %arg11[%c0_9, %c0_10], %9 {strides = array<i32>} : memref<36x256xf32, #tpu.memory_space<vmem>>, vector<4x256xf32>,
    %c0_11 = arith.constant 0 : index
    %c1 = arith.constant 1 : index
    %11 = vector.load %arg9[%c0_11, %c1] : memref<4x290xf32, #tpu.memory_space<vmem>>, vector<4x256xf32>
    %12 = vector.extract_strided_slice %0 {offsets = [1, 0], sizes = [1, 256], strides = [1, 1]} : vector<9x256xf32> to vector<1x256xf32>
    %13 = vector.broadcast %12 : vector<1x256xf32> to vector<4x256xf32>
    %14 = arith.mulf %11, %13 : vector<4x256xf32>
    %c4 = arith.constant 4 : index
    %c0_12 = arith.constant 0 : index
    %15 = vector.load %arg11[%c4, %c0_12] : memref<36x256xf32, #tpu.memory_space<vmem>>, vector<4x256xf32>
    tpu.vector_store %arg11[%c4, %c0_12], %14 {strides = array<i32>} : memref<36x256xf32, #tpu.memory_space<vmem>>, vector<4x256xf32>,
    %c0_13 = arith.constant 0 : index
    %c2 = arith.constant 2 : index
    %16 = vector.load %arg9[%c0_13, %c2] : memref<4x290xf32, #tpu.memory_space<vmem>>, vector<4x256xf32>
    %17 = vector.extract_strided_slice %0 {offsets = [2, 0], sizes = [1, 256], strides = [1, 1]} : vector<9x256xf32> to vector<1x256xf32>
    %18 = vector.broadcast %17 : vector<1x256xf32> to vector<4x256xf32>
    %19 = arith.mulf %16, %18 : vector<4x256xf32>
    %c8 = arith.constant 8 : index
    %c0_14 = arith.constant 0 : index
    %20 = vector.load %arg11[%c8, %c0_14] : memref<36x256xf32, #tpu.memory_space<vmem>>, vector<4x256xf32>
    tpu.vector_store %arg11[%c8, %c0_14], %19 {strides = array<i32>} : memref<36x256xf32, #tpu.memory_space<vmem>>, vector<4x256xf32>,
    %c0_15 = arith.constant 0 : index
    %c16 = arith.constant 16 : index
    %21 = vector.load %arg9[%c0_15, %c16] : memref<4x290xf32, #tpu.memory_space<vmem>>, vector<4x256xf32>
    %22 = vector.extract_strided_slice %0 {offsets = [3, 0], sizes = [1, 256], strides = [1, 1]} : vector<9x256xf32> to vector<1x256xf32>
    %23 = vector.broadcast %22 : vector<1x256xf32> to vector<4x256xf32>
    %24 = arith.mulf %21, %23 : vector<4x256xf32>
    %c12 = arith.constant 12 : index
    %c0_16 = arith.constant 0 : index
    %25 = vector.load %arg11[%c12, %c0_16] : memref<36x256xf32, #tpu.memory_space<vmem>>, vector<4x256xf32>
    tpu.vector_store %arg11[%c12, %c0_16], %24 {strides = array<i32>} : memref<36x256xf32, #tpu.memory_space<vmem>>, vector<4x256xf32>,
    %c0_17 = arith.constant 0 : index
    %c17_18 = arith.constant 17 : index
    %26 = vector.load %arg9[%c0_17, %c17_18] : memref<4x290xf32, #tpu.memory_space<vmem>>, vector<4x256xf32>
    %27 = vector.extract_strided_slice %0 {offsets = [4, 0], sizes = [1, 256], strides = [1, 1]} : vector<9x256xf32> to vector<1x256xf32>
    %28 = vector.broadcast %27 : vector<1x256xf32> to vector<4x256xf32>
    %29 = arith.mulf %26, %28 : vector<4x256xf32>
    %c16_19 = arith.constant 16 : index
    %c0_20 = arith.constant 0 : index
    %30 = vector.load %arg11[%c16_19, %c0_20] : memref<36x256xf32, #tpu.memory_space<vmem>>, vector<4x256xf32>
    tpu.vector_store %arg11[%c16_19, %c0_20], %29 {strides = array<i32>} : memref<36x256xf32, #tpu.memory_space<vmem>>, vector<4x256xf32>,
    %c0_21 = arith.constant 0 : index
    %c18 = arith.constant 18 : index
    %31 = vector.load %arg9[%c0_21, %c18] : memref<4x290xf32, #tpu.memory_space<vmem>>, vector<4x256xf32>
    %32 = vector.extract_strided_slice %0 {offsets = [5, 0], sizes = [1, 256], strides = [1, 1]} : vector<9x256xf32> to vector<1x256xf32>
    %33 = vector.broadcast %32 : vector<1x256xf32> to vector<4x256xf32>
    %34 = arith.mulf %31, %33 : vector<4x256xf32>
    %c20 = arith.constant 20 : index
    %c0_22 = arith.constant 0 : index
    %35 = vector.load %arg11[%c20, %c0_22] : memref<36x256xf32, #tpu.memory_space<vmem>>, vector<4x256xf32>
    tpu.vector_store %arg11[%c20, %c0_22], %34 {strides = array<i32>} : memref<36x256xf32, #tpu.memory_space<vmem>>, vector<4x256xf32>,
    %c0_23 = arith.constant 0 : index
    %c32 = arith.constant 32 : index
    %36 = vector.load %arg9[%c0_23, %c32] : memref<4x290xf32, #tpu.memory_space<vmem>>, vector<4x256xf32>
    %37 = vector.extract_strided_slice %0 {offsets = [6, 0], sizes = [1, 256], strides = [1, 1]} : vector<9x256xf32> to vector<1x256xf32>
    %38 = vector.broadcast %37 : vector<1x256xf32> to vector<4x256xf32>
    %39 = arith.mulf %36, %38 : vector<4x256xf32>
    %c24 = arith.constant 24 : index
    %c0_24 = arith.constant 0 : index
    %40 = vector.load %arg11[%c24, %c0_24] : memref<36x256xf32, #tpu.memory_space<vmem>>, vector<4x256xf32>
    tpu.vector_store %arg11[%c24, %c0_24], %39 {strides = array<i32>} : memref<36x256xf32, #tpu.memory_space<vmem>>, vector<4x256xf32>,
    %c0_25 = arith.constant 0 : index
    %c33 = arith.constant 33 : index
    %41 = vector.load %arg9[%c0_25, %c33] : memref<4x290xf32, #tpu.memory_space<vmem>>, vector<4x256xf32>
    %42 = vector.extract_strided_slice %0 {offsets = [7, 0], sizes = [1, 256], strides = [1, 1]} : vector<9x256xf32> to vector<1x256xf32>
    %43 = vector.broadcast %42 : vector<1x256xf32> to vector<4x256xf32>
    %44 = arith.mulf %41, %43 : vector<4x256xf32>
    %c28 = arith.constant 28 : index
    %c0_26 = arith.constant 0 : index
    %45 = vector.load %arg11[%c28, %c0_26] : memref<36x256xf32, #tpu.memory_space<vmem>>, vector<4x256xf32>
    tpu.vector_store %arg11[%c28, %c0_26], %44 {strides = array<i32>} : memref<36x256xf32, #tpu.memory_space<vmem>>, vector<4x256xf32>,
    %c0_27 = arith.constant 0 : index
    %c34 = arith.constant 34 : index
    %46 = vector.load %arg9[%c0_27, %c34] : memref<4x290xf32, #tpu.memory_space<vmem>>, vector<4x256xf32>
    %47 = vector.extract_strided_slice %0 {offsets = [8, 0], sizes = [1, 256], strides = [1, 1]} : vector<9x256xf32> to vector<1x256xf32>
    %48 = vector.broadcast %47 : vector<1x256xf32> to vector<4x256xf32>
    %49 = arith.mulf %46, %48 : vector<4x256xf32>
    %c32_28 = arith.constant 32 : index
    %c0_29 = arith.constant 0 : index
    %50 = vector.load %arg11[%c32_28, %c0_29] : memref<36x256xf32, #tpu.memory_space<vmem>>, vector<4x256xf32>
    tpu.vector_store %arg11[%c32_28, %c0_29], %49 {strides = array<i32>} : memref<36x256xf32, #tpu.memory_space<vmem>>, vector<4x256xf32>,
    %c0_30 = arith.constant 0 : index
    %c0_31 = arith.constant 0 : index
    %51 = vector.load %arg4[%c0_30, %c0_31] : memref<4x36xf32, #tpu.memory_space<vmem>>, vector<4x36xf32>
    %c0_32 = arith.constant 0 : index
    %c0_33 = arith.constant 0 : index
    %52 = vector.load %arg11[%c0_32, %c0_33] : memref<36x256xf32, #tpu.memory_space<vmem>>, vector<36x256xf32>
    %cst_34 = arith.constant dense<0.000000e+00> : vector<4x256xf32>
    %53 = tpu.matmul %51, %52, %cst_34 {dimension_numbers = #tpu.dot_dimension_numbers<[1], [0], [0], [1], [0, 0, 1, 1], [], []>} : vector<4x36xf32>, vector<36x256xf32>, vector<4x256xf32> -> vector<4x256xf32>
    %c0_35 = arith.constant 0 : index
    %c0_36 = arith.constant 0 : index
    %54 = vector.load %arg5[%c0_35, %c0_36] : memref<4x1xf32, #tpu.memory_space<vmem>>, vector<4x1xf32>
    %55 = vector.broadcast %54 : vector<4x1xf32> to vector<4x256xf32>
    %56 = arith.addf %53, %55 : vector<4x256xf32>
    %cst_37 = arith.constant 0.000000e+00 : f32
    %57 = vector.broadcast %cst_37 : f32 to vector<4x256xf32>
    %58 = arith.maximumf %56, %57 : vector<4x256xf32>
    %cst_38 = arith.constant 0.000000e+00 : f32
    %59 = vector.broadcast %cst_38 : f32 to vector<4x290xf32>
    %c0_39 = arith.constant 0 : index
    %c0_40 = arith.constant 0 : index
    %60 = vector.load %arg10[%c0_39, %c0_40] : memref<4x290xf32, #tpu.memory_space<vmem>>, vector<4x290xf32>
    tpu.vector_store %arg10[%c0_39, %c0_40], %59 {strides = array<i32>} : memref<4x290xf32, #tpu.memory_space<vmem>>, vector<4x290xf32>,
    %c0_41 = arith.constant 0 : index
    %c17_42 = arith.constant 17 : index
    %61 = vector.load %arg10[%c0_41, %c17_42] : memref<4x290xf32, #tpu.memory_space<vmem>>, vector<4x256xf32>
    tpu.vector_store %arg10[%c0_41, %c17_42], %58 {strides = array<i32>} : memref<4x290xf32, #tpu.memory_space<vmem>>, vector<4x256xf32>,
    %c0_43 = arith.constant 0 : index
    %c0_44 = arith.constant 0 : index
    %62 = vector.load %arg10[%c0_43, %c0_44] : memref<4x290xf32, #tpu.memory_space<vmem>>, vector<4x256xf32>
    %63 = vector.extract_strided_slice %0 {offsets = [0, 0], sizes = [1, 256], strides = [1, 1]} : vector<9x256xf32> to vector<1x256xf32>
    %64 = vector.broadcast %63 : vector<1x256xf32> to vector<4x256xf32>
    %65 = arith.mulf %62, %64 : vector<4x256xf32>
    %c0_45 = arith.constant 0 : index
    %c0_46 = arith.constant 0 : index
    %66 = vector.load %arg12[%c0_45, %c0_46] : memref<36x256xf32, #tpu.memory_space<vmem>>, vector<4x256xf32>
    tpu.vector_store %arg12[%c0_45, %c0_46], %65 {strides = array<i32>} : memref<36x256xf32, #tpu.memory_space<vmem>>, vector<4x256xf32>,
    %c0_47 = arith.constant 0 : index
    %c1_48 = arith.constant 1 : index
    %67 = vector.load %arg10[%c0_47, %c1_48] : memref<4x290xf32, #tpu.memory_space<vmem>>, vector<4x256xf32>
    %68 = vector.extract_strided_slice %0 {offsets = [1, 0], sizes = [1, 256], strides = [1, 1]} : vector<9x256xf32> to vector<1x256xf32>
    %69 = vector.broadcast %68 : vector<1x256xf32> to vector<4x256xf32>
    %70 = arith.mulf %67, %69 : vector<4x256xf32>
    %c4_49 = arith.constant 4 : index
    %c0_50 = arith.constant 0 : index
    %71 = vector.load %arg12[%c4_49, %c0_50] : memref<36x256xf32, #tpu.memory_space<vmem>>, vector<4x256xf32>
    tpu.vector_store %arg12[%c4_49, %c0_50], %70 {strides = array<i32>} : memref<36x256xf32, #tpu.memory_space<vmem>>, vector<4x256xf32>,
    %c0_51 = arith.constant 0 : index
    %c2_52 = arith.constant 2 : index
    %72 = vector.load %arg10[%c0_51, %c2_52] : memref<4x290xf32, #tpu.memory_space<vmem>>, vector<4x256xf32>
    %73 = vector.extract_strided_slice %0 {offsets = [2, 0], sizes = [1, 256], strides = [1, 1]} : vector<9x256xf32> to vector<1x256xf32>
    %74 = vector.broadcast %73 : vector<1x256xf32> to vector<4x256xf32>
    %75 = arith.mulf %72, %74 : vector<4x256xf32>
    %c8_53 = arith.constant 8 : index
    %c0_54 = arith.constant 0 : index
    %76 = vector.load %arg12[%c8_53, %c0_54] : memref<36x256xf32, #tpu.memory_space<vmem>>, vector<4x256xf32>
    tpu.vector_store %arg12[%c8_53, %c0_54], %75 {strides = array<i32>} : memref<36x256xf32, #tpu.memory_space<vmem>>, vector<4x256xf32>,
    %c0_55 = arith.constant 0 : index
    %c16_56 = arith.constant 16 : index
    %77 = vector.load %arg10[%c0_55, %c16_56] : memref<4x290xf32, #tpu.memory_space<vmem>>, vector<4x256xf32>
    %78 = vector.extract_strided_slice %0 {offsets = [3, 0], sizes = [1, 256], strides = [1, 1]} : vector<9x256xf32> to vector<1x256xf32>
    %79 = vector.broadcast %78 : vector<1x256xf32> to vector<4x256xf32>
    %80 = arith.mulf %77, %79 : vector<4x256xf32>
    %c12_57 = arith.constant 12 : index
    %c0_58 = arith.constant 0 : index
    %81 = vector.load %arg12[%c12_57, %c0_58] : memref<36x256xf32, #tpu.memory_space<vmem>>, vector<4x256xf32>
    tpu.vector_store %arg12[%c12_57, %c0_58], %80 {strides = array<i32>} : memref<36x256xf32, #tpu.memory_space<vmem>>, vector<4x256xf32>,
    %c0_59 = arith.constant 0 : index
    %c17_60 = arith.constant 17 : index
    %82 = vector.load %arg10[%c0_59, %c17_60] : memref<4x290xf32, #tpu.memory_space<vmem>>, vector<4x256xf32>
    %83 = vector.extract_strided_slice %0 {offsets = [4, 0], sizes = [1, 256], strides = [1, 1]} : vector<9x256xf32> to vector<1x256xf32>
    %84 = vector.broadcast %83 : vector<1x256xf32> to vector<4x256xf32>
    %85 = arith.mulf %82, %84 : vector<4x256xf32>
    %c16_61 = arith.constant 16 : index
    %c0_62 = arith.constant 0 : index
    %86 = vector.load %arg12[%c16_61, %c0_62] : memref<36x256xf32, #tpu.memory_space<vmem>>, vector<4x256xf32>
    tpu.vector_store %arg12[%c16_61, %c0_62], %85 {strides = array<i32>} : memref<36x256xf32, #tpu.memory_space<vmem>>, vector<4x256xf32>,
    %c0_63 = arith.constant 0 : index
    %c18_64 = arith.constant 18 : index
    %87 = vector.load %arg10[%c0_63, %c18_64] : memref<4x290xf32, #tpu.memory_space<vmem>>, vector<4x256xf32>
    %88 = vector.extract_strided_slice %0 {offsets = [5, 0], sizes = [1, 256], strides = [1, 1]} : vector<9x256xf32> to vector<1x256xf32>
    %89 = vector.broadcast %88 : vector<1x256xf32> to vector<4x256xf32>
    %90 = arith.mulf %87, %89 : vector<4x256xf32>
    %c20_65 = arith.constant 20 : index
    %c0_66 = arith.constant 0 : index
    %91 = vector.load %arg12[%c20_65, %c0_66] : memref<36x256xf32, #tpu.memory_space<vmem>>, vector<4x256xf32>
    tpu.vector_store %arg12[%c20_65, %c0_66], %90 {strides = array<i32>} : memref<36x256xf32, #tpu.memory_space<vmem>>, vector<4x256xf32>,
    %c0_67 = arith.constant 0 : index
    %c32_68 = arith.constant 32 : index
    %92 = vector.load %arg10[%c0_67, %c32_68] : memref<4x290xf32, #tpu.memory_space<vmem>>, vector<4x256xf32>
    %93 = vector.extract_strided_slice %0 {offsets = [6, 0], sizes = [1, 256], strides = [1, 1]} : vector<9x256xf32> to vector<1x256xf32>
    %94 = vector.broadcast %93 : vector<1x256xf32> to vector<4x256xf32>
    %95 = arith.mulf %92, %94 : vector<4x256xf32>
    %c24_69 = arith.constant 24 : index
    %c0_70 = arith.constant 0 : index
    %96 = vector.load %arg12[%c24_69, %c0_70] : memref<36x256xf32, #tpu.memory_space<vmem>>, vector<4x256xf32>
    tpu.vector_store %arg12[%c24_69, %c0_70], %95 {strides = array<i32>} : memref<36x256xf32, #tpu.memory_space<vmem>>, vector<4x256xf32>,
    %c0_71 = arith.constant 0 : index
    %c33_72 = arith.constant 33 : index
    %97 = vector.load %arg10[%c0_71, %c33_72] : memref<4x290xf32, #tpu.memory_space<vmem>>, vector<4x256xf32>
    %98 = vector.extract_strided_slice %0 {offsets = [7, 0], sizes = [1, 256], strides = [1, 1]} : vector<9x256xf32> to vector<1x256xf32>
    %99 = vector.broadcast %98 : vector<1x256xf32> to vector<4x256xf32>
    %100 = arith.mulf %97, %99 : vector<4x256xf32>
    %c28_73 = arith.constant 28 : index
    %c0_74 = arith.constant 0 : index
    %101 = vector.load %arg12[%c28_73, %c0_74] : memref<36x256xf32, #tpu.memory_space<vmem>>, vector<4x256xf32>
    tpu.vector_store %arg12[%c28_73, %c0_74], %100 {strides = array<i32>} : memref<36x256xf32, #tpu.memory_space<vmem>>, vector<4x256xf32>,
    %c0_75 = arith.constant 0 : index
    %c34_76 = arith.constant 34 : index
    %102 = vector.load %arg10[%c0_75, %c34_76] : memref<4x290xf32, #tpu.memory_space<vmem>>, vector<4x256xf32>
    %103 = vector.extract_strided_slice %0 {offsets = [8, 0], sizes = [1, 256], strides = [1, 1]} : vector<9x256xf32> to vector<1x256xf32>
    %104 = vector.broadcast %103 : vector<1x256xf32> to vector<4x256xf32>
    %105 = arith.mulf %102, %104 : vector<4x256xf32>
    %c32_77 = arith.constant 32 : index
    %c0_78 = arith.constant 0 : index
    %106 = vector.load %arg12[%c32_77, %c0_78] : memref<36x256xf32, #tpu.memory_space<vmem>>, vector<4x256xf32>
    tpu.vector_store %arg12[%c32_77, %c0_78], %105 {strides = array<i32>} : memref<36x256xf32, #tpu.memory_space<vmem>>, vector<4x256xf32>,
    %c0_79 = arith.constant 0 : index
    %c0_80 = arith.constant 0 : index
    %107 = vector.load %arg6[%c0_79, %c0_80] : memref<4x36xf32, #tpu.memory_space<vmem>>, vector<4x36xf32>
    %c0_81 = arith.constant 0 : index
    %c0_82 = arith.constant 0 : index
    %108 = vector.load %arg12[%c0_81, %c0_82] : memref<36x256xf32, #tpu.memory_space<vmem>>, vector<36x256xf32>
    %cst_83 = arith.constant dense<0.000000e+00> : vector<4x256xf32>
    %109 = tpu.matmul %107, %108, %cst_83 {dimension_numbers = #tpu.dot_dimension_numbers<[1], [0], [0], [1], [0, 0, 1, 1], [], []>} : vector<4x36xf32>, vector<36x256xf32>, vector<4x256xf32> -> vector<4x256xf32>
    %c0_84 = arith.constant 0 : index
    %c0_85 = arith.constant 0 : index
    %110 = vector.load %arg7[%c0_84, %c0_85] : memref<4x1xf32, #tpu.memory_space<vmem>>, vector<4x1xf32>
    %111 = vector.broadcast %110 : vector<4x1xf32> to vector<4x256xf32>
    %112 = arith.addf %109, %111 : vector<4x256xf32>
    %c0_86 = arith.constant 0 : index
    %c0_87 = arith.constant 0 : index
    %113 = memref.load %arg1[%c0_86, %c0_87] : memref<1x1xf32, #tpu.memory_space<smem>>
    %114 = vector.broadcast %113 : f32 to vector<4x256xf32>
    %115 = arith.mulf %114, %112 : vector<4x256xf32>
    %116 = arith.addf %2, %115 : vector<4x256xf32>
    %c0_88 = arith.constant 0 : index
    %c0_89 = arith.constant 0 : index
    %c0_90 = arith.constant 0 : index
    %117 = vector.load %arg8[%c0_88, %c0_89, %c0_90] : memref<1x4x256xf32, #tpu.memory_space<vmem>>, vector<1x4x256xf32>
    %118 = vector.shape_cast %117 : vector<1x4x256xf32> to vector<4x256xf32>
    %119 = vector.shape_cast %116 : vector<4x256xf32> to vector<1x4x256xf32>
    tpu.vector_store %arg8[%c0_88, %c0_89, %c0_90], %119 {strides = array<i32>} : memref<1x4x256xf32, #tpu.memory_space<vmem>>, vector<1x4x256xf32>,
    return
  }
  func.func @transform_0(%arg0: i32) -> (i32, i32) {
    %c0_i32 = arith.constant 0 : i32
    %c0_i32_0 = arith.constant 0 : i32
    %c0_i32_1 = arith.constant 0 : i32
    return %c0_i32, %c0_i32_0 : i32, i32
  }
  func.func @transform_1(%arg0: i32) -> (i32, i32) {
    %c0_i32 = arith.constant 0 : i32
    %c0_i32_0 = arith.constant 0 : i32
    %c0_i32_1 = arith.constant 0 : i32
    return %c0_i32, %c0_i32_0 : i32, i32
  }
  func.func @transform_2(%arg0: i32) -> (i32, i32, i32) {
    %c0_i32 = arith.constant 0 : i32
    %c0_i32_0 = arith.constant 0 : i32
    %c0_i32_1 = arith.constant 0 : i32
    return %arg0, %c0_i32, %c0_i32_0 : i32, i32, i32
  }
  func.func @transform_3(%arg0: i32) -> (i32, i32) {
    %c0_i32 = arith.constant 0 : i32
    %c0_i32_0 = arith.constant 0 : i32
    %c0_i32_1 = arith.constant 0 : i32
    return %c0_i32, %c0_i32_0 : i32, i32
  }
  func.func @transform_4(%arg0: i32) -> (i32, i32) {
    %c0_i32 = arith.constant 0 : i32
    %c0_i32_0 = arith.constant 0 : i32
    %c0_i32_1 = arith.constant 0 : i32
    return %c0_i32, %c0_i32_0 : i32, i32
  }
  func.func @transform_5(%arg0: i32) -> (i32, i32) {
    %c0_i32 = arith.constant 0 : i32
    %c0_i32_0 = arith.constant 0 : i32
    %c0_i32_1 = arith.constant 0 : i32
    return %c0_i32, %c0_i32_0 : i32, i32
  }
  func.func @transform_6(%arg0: i32) -> (i32, i32) {
    %c0_i32 = arith.constant 0 : i32
    %c0_i32_0 = arith.constant 0 : i32
    %c0_i32_1 = arith.constant 0 : i32
    return %c0_i32, %c0_i32_0 : i32, i32
  }
  func.func @transform_7(%arg0: i32) -> (i32, i32, i32) {
    %c0_i32 = arith.constant 0 : i32
    %c0_i32_0 = arith.constant 0 : i32
    %c0_i32_1 = arith.constant 0 : i32
    return %arg0, %c0_i32, %c0_i32_0 : i32, i32, i32
  }
}

</mosaic_0001>

<bundles_post_ra>
// kernel: resnet_block_forward.1
= control target key start
LH: loop header
LB: loop body
LE: loop exit
PB: predicated region body
PF: predicated region fallthrough
CT: control target
= control target key end

     0   :  { %s1201_s26 = smov 0   ;;  %s1442_s0 = inlined_call_operand.<no memory space> [shape: f32[1,1], index: 0, kind: input, shape index: {}]   ;;  %s1443_s1 = inlined_call_operand.vmem [shape: f32[9,256], index: 1, kind: input, shape index: {}]   ;;  %s1444_s2 = inlined_call_operand.vmem [shape: f32[2,4,256], index: 2, kind: input, shape index: {}]   ;;  %s1445_s3 = inlined_call_operand.vmem [shape: f32[4,36], index: 3, kind: input, shape index: {}]   ;;  %s1446_s4 = inlined_call_operand.vmem [shape: f32[4,1], index: 4, kind: input, shape index: {}]   ;;  %s1447_s5 = inlined_call_operand.vmem [shape: f32[4,36], index: 5, kind: input, shape index: {}]   ;;  %s1448_s6 = inlined_call_operand.vmem [shape: f32[4,1], index: 6, kind: input, shape index: {}]   ;;  %s1449_s7 = inlined_call_operand.vmem [shape: f32[2,4,256], index: 7, kind: output, shape index: {}]  }
   0x1   :  { %12 = sst [smem:[#allocation6]] %s1442_s0 }
   0x2 LB: > { %s1067_s27 = sadd.s32 4294967295, %s1138_s26   ;;  %p1071_p0 = scmp.ge.s32.totalorder %s1138_s26, 1  ;;  %s1138_s26 = sphi %s1201_s26, %s18_s26  }
   0x3   : > { %p238_p1 = scmp.lt.s32.totalorder %s1138_s26, 3 }
   0x5   : > { %p239_p2 = pnand %p1071_p0, %p238_p1 }
   0x6   : > { %p270_p3 = scmp.lt.s32.totalorder (!%p239_p2), %s1067_s27, 1  ;;  %v303_v0 = vlaneseq (!%p239_p2)  ;;  %vm286_vm0 = vcmask (!%p239_p2), 273408   ;;  %v1140_v2 = vmov (!%p239_p2), 0.0   ;;  %v280_v3 = vld [vmem:[%s1443_s1] sm:$0xff] (!%p239_p2)  ;;  %v281_v4 = vld [vmem:[%s1443_s1 + $0x8] sm:$0xff] (!%p239_p2)  ;;  %s1141_s12 = smov (!%p239_p2), 17  }
   0x7   : > { %242 = sbr.rel (%p239_p2) target bundleno = 1056 (0x420), region = 48  ;;  %285 = vst [vmem:[#allocation2] sm:$0xff] (!%p239_p2), %v1140_v2  ;;  %287 = vst.msk [vmem:[#allocation2 + $0x8] sm:$0xf] (!%p239_p2), %vm286_vm0, %v1140_v2  ;;  %720 = vmatprep.mubr.f32.mxu0 (!%p239_p2), %v1140_v2  ;;  %995 = vmatprep.mubr.f32.mxu1 (!%p239_p2), %v1140_v2  ;;  %s1142_s13 = smov (!%p239_p2), 1   ;;  %vm296_vm1 = vcmask (!%p239_p2), 1043592  }
   0x8   : > { %v304_v1 = vshrl.u32 (!%p239_p2), %v303_v0, 7  ;;  %729 = vst [vmem:[#allocation3] sm:$0xff] (!%p239_p2), %v1140_v2  ;;  %730 = vst.msk [vmem:[#allocation3 + $0x8] sm:$0xf] (!%p239_p2), %vm286_vm0, %v1140_v2  ;;  %s1143_s14 = smov (!%p239_p2), 2   ;;  %s1144_s15 = smov (!%p239_p2), 16  }
   0x9   : > { %v1076_v37 = vld [vmem:[%s1443_s1 + $0x10] ss:$0 sm:$0xff] (!%p239_p2)  ;;  %v1077_v38 = vld [vmem:[%s1443_s1 + $0x18] ss:$0 sm:$0xff] (!%p239_p2)  ;;  %s1145_s20 = smov (!%p239_p2), 32   ;;  %s1146_s21 = smov (!%p239_p2), 18  }
   0xa   : > { %v305_v5 = vsub.s32 (!%p239_p2), 0, %v304_v1  ;;  %v325_v6 = vsub.s32 (!%p239_p2), 1, %v304_v1  ;;  %v364_v7 = vsub.s32 (!%p239_p2), 2, %v304_v1  ;;  %v402_v8 = vsub.s32 (!%p239_p2), 3, %v304_v1  ;;  %s1147_s22 = smov (!%p239_p2), 33   ;;  %s1148_s23 = smov (!%p239_p2), 34  }
   0xb   : > { %v441_v9 = vsub.s32 (!%p239_p2), 4, %v304_v1  ;;  %v517_v10 = vsub.s32 (!%p239_p2), 6, %v304_v1  ;;  %v478_v11 = vsub.s32 (!%p239_p2), 5, %v304_v1  ;;  %v555_v28 = vsub.s32 (!%p239_p2), 7, %v304_v1  ;;  %s1149_s24 = smov (!%p239_p2), 126   ;;  %s1150_s25 = smov (!%p239_p2), 111  }
   0xc   : > { %v310_v13 = vrot.slane (!%p239_p2), %v281_v4, %v305_v5  ;;  %v326_v14 = vrot.slane (!%p239_p2), %v280_v3, %v325_v6  ;;  %v330_v15 = vrot.slane (!%p239_p2), %v281_v4, %v325_v6  ;;  %v306_v16 = vrot.slane (!%p239_p2), %v280_v3, %v305_v5  ;;  %s1151_s0 = smov (!%p239_p2), 96   ;;  %s1152_s28 = smov (!%p239_p2), 127  }
   0xd   : > { %v365_v17 = vrot.slane (!%p239_p2), %v280_v3, %v364_v7  ;;  %v369_v18 = vrot.slane (!%p239_p2), %v281_v4, %v364_v7  ;;  %v403_v19 = vrot.slane (!%p239_p2), %v280_v3, %v402_v8  ;;  %v407_v20 = vrot.slane (!%p239_p2), %v281_v4, %v402_v8  ;;  %s1153_s29 = smov (!%p239_p2), 110   ;;  %s1154_s30 = smov (!%p239_p2), 112  }
   0xe   : > { %s1453_s27 = smov (!%p270_p3, %s1067_s27), 1  ;;  %v333_v21 = vcombine.low %v326_v14, %v330_v15  ;;  %v442_v22 = vrot.slane %v280_v3, %v441_v9  ;;  %v446_v23 = vrot.slane %v281_v4, %v441_v9  ;;  %v518_v26 = vrot.slane %v280_v3, %v517_v10  ;;  %s1155_s9 = smov 95  }
   0xf   : > { %s1086_s8 = sshll.u32 %s1453_s27, 3  ;;  %v372_v24 = vcombine.low %v365_v17, %v369_v18  ;;  %v410_v25 = vcombine.low %v403_v19, %v407_v20  ;;  %v522_v27 = vrot.slane %v281_v4, %v517_v10  ;;  %v479_v30 = vrot.slane %v280_v3, %v478_v11  ;;  %s1156_s10 = smov 94  }
  0x10   : > { %s274_s11 = scalar_lea.vmem %s1444_s2, %s1086_s8  ;;  %334 = vrot.lane.b32.xlu1 %v333_v21, %s1142_s13  ;;  %v449_v29 = vcombine.low %v442_v22, %v446_v23  ;;  %v483_v31 = vrot.slane %v281_v4, %v478_v11  ;;  %v1227_v32 = vcombine.low %v306_v16, %v310_v13  ;;  %v556_v34 = vrot.slane %v280_v3, %v555_v28  ;;  %s1002_s19 = sld [smem:[#allocation6]] }
  0x11   : > { %v1223_v12 = vld [vmem:[%s274_s11] sm:$0xff]  ;;  %v525_v33 = vcombine.low %v518_v26, %v522_v27  ;;  %v560_v35 = vrot.slane %v281_v4, %v555_v28  ;;  %v602_v40 = vcombine.low %v1076_v37, %v1077_v38  ;;  %vm297_vm2 = vcmask 1047556  }
  0x12   : > { %289 = vrot.lane.b32.xlu0 %v1223_v12, %s1141_s12  ;;  %v486_v36 = vcombine.low %v479_v30, %v483_v31  ;;  %vm292_vm3 = vcmask 138240   ;;  %vm300_vm4 = vcmask 134144   ;;  %vm1236_vm5 = vmor %vm297_vm2, %vm296_vm1  ;;  %vm376_vm6 = vcmask 15360  }
  0x13   : > { %v563_v39 = vcombine.low %v556_v34, %v560_v35  ;;  %vm490_vm7 = vcmask 146432   ;;  %vm337_vm8 = vcmask 7168   ;;  %vm414_vm9 = vcmask 130048  }
  0x14   : > { %411 = vrot.lane.b32.xlu1 %v410_v25, %s1144_s15  ;;  %vm567_vm10 = vcmask 269312   ;;  %vm529_vm11 = vcmask 261120   ;;  %vm606_vm12 = vcmask 277504   ;;  %vm506_vm13 = vcmask 900096  }
  0x15   : > { %vm583_vm14 = vcmask 777216   ;;  %vm391_vm15 = vcmask 1031168   ;;  %vm353_vm0 = vcmask 1039360   ;;  %vm430_vm1 = vcmask 916480  }
  0x16   : > { %373 = vrot.lane.b32.xlu0 %v372_v24, %s1143_s14  ;;  %vm467_vm2 = vcmask 908288  }
  0x18   : > { %526 = vrot.lane.b32.xlu1 %v525_v33, %s1145_s20 }
  0x1a   : > { %450 = vrot.lane.b32.xlu0 %v449_v29, %s1141_s12 }
  0x1c   : > { %564 = vrot.lane.b32.xlu1 %v563_v39, %s1147_s22  ;;  %s279_s22 = scalar_lea.vmem %s1449_s7, %s1086_s8 }
  0x1e   : > { %487 = vrot.lane.b32.xlu0 %v486_v36, %s1146_s21 }
  0x22   : > { %603 = vrot.lane.b32.xlu0 %v602_v40, %s1148_s23 }
  0x82   : > { %v335_v45 = vpop.permute.xlu1 %334 }
  0x83   : > { %v1258_v60 = vrot.slane %v335_v45, 4 }
  0x84   : > { %v290_v41 = vpop.permute.xlu0 %289 }
  0x85   : > { %v291_v43 = vrot.slane %v290_v41, 4  ;;  %v1276_v5 = vsel %vm337_vm8, %v1258_v60, %v335_v45  ;;  %vm649_vm8 = vcmask 1043456  }
  0x86   : > { %v412_v47 = vpop.permute.xlu1 %411 }
  0x87   : > { %v293_v44 = vsel %vm292_vm3, %v291_v43, %v290_v41  ;;  %301 = vst.msk [vmem:[#allocation2 + $0x8] sm:$0xf] %vm300_vm4, %v291_v43  ;;  %v1266_v2 = vrot.slane %v412_v47, 4 }
  0x88   : > { %299 = vst.msk [vmem:[#allocation2] sm:$0xff] %vm1236_vm5, %v293_v44  ;;  %v374_v46 = vpop.permute.xlu0 %373 }
  0x89   : > { %v1244_v49 = vrot.slane %v374_v46, 4  ;;  %v1285_v9 = vsel %vm414_vm9, %v1266_v2, %v412_v47  ;;  %v1157_v47 = vmov 0   ;;  %vm645_vm9 = vcmask 293888  }
  0x8a   : > { %v527_v53 = vpop.permute.xlu1 %526  ;;  %1130 = vset.pattern.permute.xlu1 %v1157_v47  ;;  %1131 = vset.pattern.permute.xlu0 %v1157_v47 }
  0x8b   : > { %v1252_v58 = vrot.slane %v527_v53, 4  ;;  %v1261_v61 = vsel %vm376_vm6, %v1244_v49, %v374_v46  ;;  %vm544_vm6 = vcmask 785408  }
  0x8c   : > { %v451_v48 = vpop.permute.xlu0 %450 }
  0x8d   : > { %v1246_v50 = vrot.slane %v451_v48, 4  ;;  %v1307_v22 = vsel %vm529_vm11, %v1252_v58, %v527_v53 }
  0x8e   : > { %v361_v51 = vld [vmem:[#allocation2 + $0x8] sm:$0xf]  ;;  %v565_v0 = vpop.permute.xlu1 %564 }
  0x8f   : > { %v438_v52 = vld [vmem:[#allocation2 + $0x8] sm:$0xf]  ;;  %v381_v54 = vmul.f32 %v1244_v49, %v361_v51  ;;  %v1250_v56 = vld [vmem:[#allocation2] sm:$0xff]  ;;  %v1271_v4 = vrot.slane %v565_v0, 4  ;;  %v1299_v17 = vsel %vm292_vm3, %v1246_v50, %v451_v48 }
  0x90   : > { %v457_v55 = vmul.f32 %v1246_v50, %v438_v52  ;;  %v488_v57 = vpop.permute.xlu0 %487  ;;  %v514_v62 = vld [vmem:[#allocation2 + $0x8] sm:$0xf]  ;;  %v380_v63 = vmul.f32 %v1261_v61, %v1250_v56  ;;  %v341_v6 = vmul.f32 %v1276_v5, %v1250_v56  ;;  %v315_v8 = vmul.f32 %v1227_v32, %v1250_v56  ;;  %v639_v48 = vld [vmem:[%s1446_s4] sm:$0xf] }
  0x91   : > { %v1254_v59 = vrot.slane %v488_v57, 4  ;;  %389 = vrot.lane.b32.xlu0 %v381_v54, %s1149_s24  ;;  %v534_v1 = vmul.f32 %v1252_v58, %v514_v62  ;;  %v1288_v10 = vsel %vm567_vm10, %v1271_v4, %v565_v0  ;;  %v475_v13 = vld [vmem:[#allocation2 + $0x8] sm:$0xf]  ;;  %v418_v14 = vmul.f32 %v1285_v9, %v1250_v56 }
  0x92   : > { %465 = vrot.lane.b32.xlu1 %v457_v55, %s1150_s25  ;;  %v317_v11 = vcombine.high %v315_v8, %v315_v8  ;;  %319 = vst [vmem:[#allocation4] sm:$0xf] %v315_v8  ;;  %v571_v15 = vmul.f32 %v1288_v10, %v1250_v56  ;;  %v552_v18 = vld [vmem:[#allocation2 + $0x8] sm:$0xf]  ;;  %v456_v19 = vmul.f32 %v1299_v17, %v1250_v56 }
  0x93   : > { %v1269_v3 = vsel %vm490_vm7, %v1254_v59, %v488_v57  ;;  %v495_v16 = vmul.f32 %v1254_v59, %v475_v13  ;;  %v572_v21 = vmul.f32 %v1271_v4, %v552_v18  ;;  %v322_v23 = vld [vmem:[#allocation2 + $0x8] sm:$0xf]  ;;  %v533_v24 = vmul.f32 %v1307_v22, %v1250_v56 }
  0x94   : > { %v494_v7 = vmul.f32 %v1269_v3, %v1250_v56  ;;  %320 = vst [vmem:[#allocation4 + $0x8] sm:$0xf] %v317_v11  ;;  %v342_v26 = vmul.f32 %v1258_v60, %v322_v23  ;;  %v399_v27 = vld [vmem:[#allocation2 + $0x8] sm:$0xf]  ;;  %v384_v28 = vcombine.high %v380_v63, %v380_v63  ;;  %v604_v31 = vpop.permute.xlu0 %603  ;;  %v345_v33 = vcombine.low %v341_v6, %v341_v6 }
  0x95   : > { %385 = vrot.lane.b32.xlu0 %v380_v63, %s1149_s24  ;;  %v499_v20 = vcombine.low %v495_v16, %v495_v16  ;;  %v576_v25 = vcombine.low %v572_v21, %v572_v21  ;;  %v419_v30 = vmul.f32 %v1266_v2, %v399_v27  ;;  %v1319_v35 = vrot.slane %v604_v31, 4  ;;  %v591_v45 = vld [vmem:[#allocation2 + $0x8] sm:$0xf] }
  0x96   : > { %542 = vrot.lane.b32.xlu1 %v534_v1, %s1151_s0  ;;  %v346_v29 = vcombine.low %v342_v26, %v342_v26  ;;  %v422_v36 = vcombine.low %v418_v14, %v418_v14  ;;  %v460_v37 = vcombine.high %v456_v19, %v456_v19  ;;  %v537_v40 = vcombine.high %v533_v24, %v533_v24 }
  0x97   : > { %v423_v34 = vcombine.low %v419_v30, %v419_v30  ;;  %v1324_v38 = vsel %vm606_vm12, %v1319_v35, %v604_v31  ;;  %v498_v41 = vcombine.low %v494_v7, %v494_v7  ;;  %v575_v43 = vcombine.low %v571_v15, %v571_v15 }
  0x98   : > { %v610_v39 = vmul.f32 %v1324_v38, %v1250_v56  ;;  %v611_v46 = vmul.f32 %v1319_v35, %v591_v45  ;;  %vm621_vm7 = vcmask 769024  }
  0x99   : > { %502 = vrot.lane.b32.xlu0 %v494_v7, %s1153_s29 }
  0x9a   : > { %349 = vrot.lane.b32.xlu1 %v341_v6, %s1152_s28  ;;  %v614_v44 = vcombine.high %v610_v39, %v610_v39 }
  0x9d   : > { %579 = vrot.lane.b32.xlu0 %v571_v15, %s1155_s9 }
  0x9e   : > { %426 = vrot.lane.b32.xlu1 %v418_v14, %s1154_s30 }
  0xa1   : > { %461 = vrot.lane.b32.xlu0 %v456_v19, %s1150_s25 }
  0xa2   : > { %504 = vrot.lane.b32.xlu1 %v499_v20, %s1153_s29 }
  0xa5   : > { %538 = vrot.lane.b32.xlu0 %v533_v24, %s1151_s0 }
  0xa6   : > { %581 = vrot.lane.b32.xlu1 %v576_v25, %s1155_s9 }
  0xa9   : > { %351 = vrot.lane.b32.xlu0 %v346_v29, %s1152_s28 }
  0xaa   : > { %387 = vrot.lane.b32.xlu1 %v384_v28, %s1149_s24 }
  0xad   : > { %428 = vrot.lane.b32.xlu0 %v423_v34, %s1154_s30 }
  0xae   : > { %347 = vrot.lane.b32.xlu1 %v345_v33, %s1152_s28 }
  0xb1   : > { %463 = vrot.lane.b32.xlu0 %v460_v37, %s1150_s25 }
  0xb2   : > { %424 = vrot.lane.b32.xlu1 %v422_v36, %s1154_s30 }
  0xb5   : > { %540 = vrot.lane.b32.xlu0 %v537_v40, %s1151_s0 }
  0xb6   : > { %500 = vrot.lane.b32.xlu1 %v498_v41, %s1153_s29 }
  0xb9   : > { %617 = vrot.lane.b32.xlu0 %v614_v44, %s1156_s10 }
  0xba   : > { %577 = vrot.lane.b32.xlu1 %v575_v43, %s1155_s9 }
  0xbd   : > { %615 = vrot.lane.b32.xlu0 %v610_v39, %s1156_s10 }
  0xbe   : > { %619 = vrot.lane.b32.xlu1 %v611_v46, %s1156_s10 }
  0xc2   : > { %642 = vperm.xlu1 %1130, %v639_v48  }
 0x103   : > { %v390_v52 = vpop.permute.xlu0 %389 }
 0x104   : > { %v466_v51 = vpop.permute.xlu1 %465 }
 0x107   : > { %v386_v54 = vpop.permute.xlu0 %385 }
 0x108   : > { %v543_v53 = vpop.permute.xlu1 %542 }
 0x10b   : > { %v503_v56 = vpop.permute.xlu0 %502 }
 0x10c   : > { %v350_v55 = vpop.permute.xlu1 %349 }
 0x10f   : > { %v580_v62 = vpop.permute.xlu0 %579 }
 0x110   : > { %v427_v57 = vpop.permute.xlu1 %426 }
 0x113   : > { %v462_v0 = vpop.permute.xlu0 %461 }
 0x114   : > { %v505_v63 = vpop.permute.xlu1 %504 }
 0x115   : > { %v508_v1 = vsel %vm506_vm13, %v503_v56, %v505_v63  ;;  %v628_v63 = vld [vmem:[%s1445_s3] sm:$0xf] }
 0x116   : > { %512 = vst [vmem:[#allocation4 + $0x28] sm:$0xf0] %v508_v1 }
 0x117   : > { %v539_v7 = vpop.permute.xlu0 %538 }
 0x118   : > { %v582_v6 = vpop.permute.xlu1 %581 }
 0x119   : > { %v585_v8 = vsel %vm583_vm14, %v580_v62, %v582_v6 }
 0x11a   : > { %589 = vst [vmem:[#allocation4 + $0x38] sm:$0xf0] %v585_v8 }
 0x11b   : > { %v352_v13 = vpop.permute.xlu0 %351 }
 0x11c   : > { %v388_v11 = vpop.permute.xlu1 %387  ;;  %v355_v16 = vsel %vm353_vm0, %v350_v55, %v352_v13 }
 0x11d   : > { %v392_v14 = vsel %vm391_vm15, %v386_v54, %v388_v11  ;;  %v393_v15 = vsel %vm391_vm15, %v388_v11, %v390_v52  ;;  %359 = vst [vmem:[#allocation4 + $0x8] sm:$0xf0] %v355_v16 }
 0x11e   : > { %396 = vst [vmem:[#allocation4 + $0x10] sm:$0xf] %v392_v14  ;;  %397 = vst [vmem:[#allocation4 + $0x18] sm:$0xf] %v393_v15 }
 0x11f   : > { %v429_v19 = vpop.permute.xlu0 %428 }
 0x120   : > { %v348_v18 = vpop.permute.xlu1 %347  ;;  %v432_v21 = vsel %vm430_vm1, %v427_v57, %v429_v19 }
 0x121   : > { %v354_v20 = vsel %vm353_vm0, %v348_v18, %v350_v55  ;;  %436 = vst [vmem:[#allocation4 + $0x18] sm:$0xf0] %v432_v21 }
 0x122   : > { %358 = vst [vmem:[#allocation4] sm:$0xf0] %v354_v20 }
 0x123   : > { %v464_v24 = vpop.permute.xlu0 %463 }
 0x124   : > { %v425_v23 = vpop.permute.xlu1 %424  ;;  %v468_v26 = vsel %vm467_vm2, %v462_v0, %v464_v24  ;;  %v469_v27 = vsel %vm467_vm2, %v464_v24, %v466_v51  ;;  %v630_v34 = vld [vmem:[#allocation4 + $0x8] sm:$0xff] }
 0x125   : > { %v431_v25 = vsel %vm430_vm1, %v425_v23, %v427_v57  ;;  %472 = vst [vmem:[#allocation4 + $0x20] sm:$0xf] %v468_v26  ;;  %473 = vst [vmem:[#allocation4 + $0x28] sm:$0xf] %v469_v27 }
 0x126   : > { %435 = vst [vmem:[#allocation4 + $0x10] sm:$0xf0] %v431_v25 }
 0x127   : > { %v541_v29 = vpop.permute.xlu0 %540 }
 0x128   : > { %v501_v28 = vpop.permute.xlu1 %500  ;;  %v545_v31 = vsel %vm544_vm6, %v539_v7, %v541_v29  ;;  %v546_v33 = vsel %vm544_vm6, %v541_v29, %v543_v53  ;;  %v632_v36 = vld [vmem:[#allocation4 + $0x18] sm:$0xff] }
 0x129   : > { %v507_v30 = vsel %vm506_vm13, %v501_v28, %v503_v56  ;;  %549 = vst [vmem:[#allocation4 + $0x30] sm:$0xf] %v545_v31  ;;  %550 = vst [vmem:[#allocation4 + $0x38] sm:$0xf] %v546_v33  ;;  %v1088_v37 = vpack.c.bf16 %v632_v36, %v630_v34  ;;  %v629_v43 = vld [vmem:[#allocation4] sm:$0xff] }
 0x12a   : > { %511 = vst [vmem:[#allocation4 + $0x20] sm:$0xf0] %v507_v30 }
 0x12b   : > { %1089 = vmatprep.subr.bf16.mxu0 %v1088_v37  ;;  %v618_v40 = vpop.permute.xlu0 %617 }
 0x12c   : > { %v578_v39 = vpop.permute.xlu1 %577  ;;  %v634_v52 = vld [vmem:[#allocation4 + $0x28] sm:$0xff] }
 0x12d   : > { %v584_v41 = vsel %vm583_vm14, %v578_v39, %v580_v62  ;;  %v631_v44 = vld [vmem:[#allocation4 + $0x10] sm:$0xff] }
 0x12e   : > { %588 = vst [vmem:[#allocation4 + $0x30] sm:$0xf0] %v584_v41  ;;  %v1090_v45 = vpack.c.bf16 %v631_v44, %v629_v43 }
 0x12f   : > { %v616_v47 = vpop.permute.xlu0 %615 }
 0x130   : > { %v620_v46 = vpop.permute.xlu1 %619  ;;  %1091 = vmatpush1.bf16.msra.mxu0 %v1090_v45  ;;  %v622_v51 = vsel %vm621_vm7, %v616_v47, %v618_v40  ;;  %v636_v53 = vld [vmem:[#allocation4 + $0x38] sm:$0xff] }
 0x131   : > { %v623_v48 = vsel %vm621_vm7, %v618_v40, %v620_v46  ;;  %626 = vst [vmem:[#allocation4 + $0x40] sm:$0xf] %v622_v51  ;;  %v1092_v54 = vpack.c.bf16 %v636_v53, %v634_v52  ;;  %v633_v55 = vld [vmem:[#allocation4 + $0x20] sm:$0xff] }
 0x132   : > { %627 = vst [vmem:[#allocation4 + $0x48] sm:$0xf] %v623_v48 }
 0x133   : > { %1093 = vmatprep.subr.bf16.mxu0 %v1092_v54 }
 0x135   : > { %v635_v56 = vld [vmem:[#allocation4 + $0x30] sm:$0xff] }
 0x136   : > { %v1094_v57 = vpack.c.bf16 %v635_v56, %v633_v55 }
 0x138   : > { %1095 = vmatpush1.bf16.msra.mxu0 %v1094_v57  ;;  %v637_v0 = vld [vmem:[#allocation4 + $0x40] sm:$0xf] }
 0x139   : > { %v638_v62 = vld [vmem:[#allocation4 + $0x48] sm:$0xf] }
 0x13a   : > { %1078 = vmatprep.subr.msk.mxu0 %vm649_vm8, %v638_v62 }
 0x13c   : > { %1079 = vmatpush1.msk.msra.mxu0 %vm649_vm8, %v637_v0 }
 0x13d   : > { %1080 = vmatmul.mubr.msk.f32.vlgmr.msra.gmra.mrb[0].mxu0 %vm645_vm9, %v628_v63 }
 0x141   : > { %v643_v1 = vpop.permute.xlu1 %642 }
 0x210   : > { %v722_v6 = vpop.f32.mrb[0].mxu0 }
 0x211   : > { %v723_v7 = vadd.f32 %v722_v6, %v643_v1  ;;  %v724_v8 = vpop.f32.mrb[1].mxu0 }
 0x212   : > { %v725_v11 = vadd.f32 %v724_v8, %v643_v1 }
 0x213   : > { %v727_v13 = vmax.f32 %v723_v7, 0.0 }
 0x214   : > { %v728_v14 = vmax.f32 %v725_v11, 0.0 }
 0x216   : > { %v733_v15 = vcombine.low %v727_v13, %v728_v14 }
 0x218   : > { %734 = vrot.lane.b32.xlu0 %v733_v15, %s1141_s12 }
 0x28a   : > { %v735_v16 = vpop.permute.xlu0 %734 }
 0x28b   : > { %v736_v18 = vrot.slane %v735_v16, 4 }
 0x28d   : > { %v737_v19 = vsel %vm292_vm3, %v736_v18, %v735_v16  ;;  %741 = vst.msk [vmem:[#allocation3 + $0x8] sm:$0xf] %vm300_vm4, %v736_v18 }
 0x28e   : > { %740 = vst.msk [vmem:[#allocation3] sm:$0xff] %vm1236_vm5, %v737_v19 }
 0x294   : > { %v809_v20 = vld [vmem:[#allocation3 + $0x8] sm:$0xf] }
 0x295   : > { %v770_v21 = vld [vmem:[#allocation3 + $0x8] sm:$0xf]  ;;  %v811_v23 = vmul.f32 %v809_v20, %v1246_v50  ;;  %v742_v25 = vld [vmem:[#allocation3] sm:$0xff] }
 0x296   : > { %v772_v24 = vmul.f32 %v770_v21, %v1244_v49  ;;  %v848_v26 = vld [vmem:[#allocation3 + $0x8] sm:$0xf]  ;;  %v771_v28 = vmul.f32 %v742_v25, %v1261_v61  ;;  %v743_v42 = vmul.f32 %v742_v25, %v1227_v32  ;;  %v829_v50 = vmul.f32 %v742_v25, %v1269_v3 }
 0x297   : > { %819 = vrot.lane.b32.xlu1 %v811_v23, %s1150_s25  ;;  %v850_v27 = vmul.f32 %v848_v26, %v1252_v58  ;;  %v751_v49 = vmul.f32 %v742_v25, %v1276_v5  ;;  %v828_v29 = vld [vmem:[#allocation3 + $0x8] sm:$0xf]  ;;  %v868_v58 = vmul.f32 %v742_v25, %v1288_v10  ;;  %v790_v61 = vmul.f32 %v742_v25, %v1285_v9 }
 0x298   : > { %780 = vrot.lane.b32.xlu0 %v772_v24, %s1149_s24  ;;  %v745_v30 = vcombine.high %v743_v42, %v743_v42  ;;  %747 = vst [vmem:[#allocation5] sm:$0xf] %v743_v42  ;;  %v830_v31 = vmul.f32 %v828_v29, %v1254_v59  ;;  %v867_v33 = vld [vmem:[#allocation3 + $0x8] sm:$0xf]  ;;  %v810_v32 = vmul.f32 %v742_v25, %v1299_v17 }
 0x299   : > { %v869_v5 = vmul.f32 %v867_v33, %v1271_v4  ;;  %v750_v34 = vld [vmem:[#allocation3 + $0x8] sm:$0xf]  ;;  %v849_v10 = vmul.f32 %v742_v25, %v1307_v22  ;;  %v775_v17 = vcombine.high %v771_v28, %v771_v28  ;;  %v755_v40 = vcombine.low %v751_v49, %v751_v49 }
 0x29a   : > { %748 = vst [vmem:[#allocation5 + $0x8] sm:$0xf] %v745_v30  ;;  %v834_v3 = vcombine.low %v830_v31, %v830_v31  ;;  %v752_v59 = vmul.f32 %v750_v34, %v1258_v60  ;;  %v789_v36 = vld [vmem:[#allocation3 + $0x8] sm:$0xf]  ;;  %v814_v60 = vcombine.high %v810_v32, %v810_v32  ;;  %v794_v22 = vcombine.low %v790_v61, %v790_v61 }
 0x29b   : > { %858 = vrot.lane.b32.xlu1 %v850_v27, %s1151_s0  ;;  %v873_v9 = vcombine.low %v869_v5, %v869_v5  ;;  %v791_v39 = vmul.f32 %v789_v36, %v1266_v2  ;;  %v853_v41 = vcombine.high %v849_v10, %v849_v10  ;;  %v833_v43 = vcombine.low %v829_v50, %v829_v50  ;;  %v887_v46 = vld [vmem:[#allocation3 + $0x8] sm:$0xf] }
 0x29c   : > { %776 = vrot.lane.b32.xlu0 %v771_v28, %s1149_s24  ;;  %v756_v37 = vcombine.low %v752_v59, %v752_v59  ;;  %v888_v2 = vmul.f32 %v742_v25, %v1324_v38  ;;  %v872_v45 = vcombine.low %v868_v58, %v868_v58  ;;  %v889_v47 = vmul.f32 %v887_v46, %v1319_v35  ;;  %v916_v38 = vld [vmem:[%s1448_s6] sm:$0xf] }
 0x29d   : > { %v795_v4 = vcombine.low %v791_v39, %v791_v39 }
 0x29e   : > { %v892_v44 = vcombine.high %v888_v2, %v888_v2 }
 0x29f   : > { %759 = vrot.lane.b32.xlu1 %v751_v49, %s1152_s28 }
 0x2a0   : > { %837 = vrot.lane.b32.xlu0 %v829_v50, %s1153_s29 }
 0x2a3   : > { %798 = vrot.lane.b32.xlu1 %v790_v61, %s1154_s30 }
 0x2a4   : > { %876 = vrot.lane.b32.xlu0 %v868_v58, %s1155_s9 }
 0x2a7   : > { %839 = vrot.lane.b32.xlu1 %v834_v3, %s1153_s29 }
 0x2a8   : > { %815 = vrot.lane.b32.xlu0 %v810_v32, %s1150_s25 }
 0x2ab   : > { %878 = vrot.lane.b32.xlu1 %v873_v9, %s1155_s9 }
 0x2ac   : > { %854 = vrot.lane.b32.xlu0 %v849_v10, %s1151_s0 }
 0x2af   : > { %778 = vrot.lane.b32.xlu1 %v775_v17, %s1149_s24 }
 0x2b0   : > { %761 = vrot.lane.b32.xlu0 %v756_v37, %s1152_s28 }
 0x2b3   : > { %757 = vrot.lane.b32.xlu1 %v755_v40, %s1152_s28 }
 0x2b4   : > { %800 = vrot.lane.b32.xlu0 %v795_v4, %s1154_s30 }
 0x2b7   : > { %796 = vrot.lane.b32.xlu1 %v794_v22, %s1154_s30 }
 0x2b8   : > { %817 = vrot.lane.b32.xlu0 %v814_v60, %s1150_s25  ;;  %v905_v60 = vld [vmem:[%s1447_s5] sm:$0xf] }
 0x2bb   : > { %835 = vrot.lane.b32.xlu1 %v833_v43, %s1153_s29 }
 0x2bc   : > { %856 = vrot.lane.b32.xlu0 %v853_v41, %s1151_s0 }
 0x2bf   : > { %874 = vrot.lane.b32.xlu1 %v872_v45, %s1155_s9 }
 0x2c0   : > { %895 = vrot.lane.b32.xlu0 %v892_v44, %s1156_s10 }
 0x2c3   : > { %897 = vrot.lane.b32.xlu1 %v889_v47, %s1156_s10 }
 0x2c4   : > { %893 = vrot.lane.b32.xlu0 %v888_v2, %s1156_s10  ;;  %v1003_v2 = vstv %s1002_s19 }
 0x2c7   : > { %919 = vperm.xlu1 %1130, %v916_v38  }
 0x309   : > { %v820_v48 = vpop.permute.xlu1 %819 }
 0x30a   : > { %v781_v51 = vpop.permute.xlu0 %780 }
 0x30d   : > { %v859_v52 = vpop.permute.xlu1 %858 }
 0x30e   : > { %v777_v53 = vpop.permute.xlu0 %776 }
 0x311   : > { %v760_v55 = vpop.permute.xlu1 %759 }
 0x312   : > { %v838_v54 = vpop.permute.xlu0 %837 }
 0x315   : > { %v799_v57 = vpop.permute.xlu1 %798 }
 0x316   : > { %v877_v56 = vpop.permute.xlu0 %876 }
 0x319   : > { %v840_v63 = vpop.permute.xlu1 %839 }
 0x31a   : > { %v816_v62 = vpop.permute.xlu0 %815  ;;  %v842_v35 = vsel %vm506_vm13, %v838_v54, %v840_v63 }
 0x31b   : > { %846 = vst [vmem:[#allocation5 + $0x28] sm:$0xf0] %v842_v35 }
 0x31d   : > { %v879_v1 = vpop.permute.xlu1 %878 }
 0x31e   : > { %v855_v0 = vpop.permute.xlu0 %854  ;;  %v881_v6 = vsel %vm583_vm14, %v877_v56, %v879_v1 }
 0x31f   : > { %885 = vst [vmem:[#allocation5 + $0x38] sm:$0xf0] %v881_v6 }
 0x321   : > { %v779_v8 = vpop.permute.xlu1 %778 }
 0x322   : > { %v762_v7 = vpop.permute.xlu0 %761  ;;  %v782_v13 = vsel %vm391_vm15, %v777_v53, %v779_v8  ;;  %v783_v14 = vsel %vm391_vm15, %v779_v8, %v781_v51 }
 0x323   : > { %v764_v11 = vsel %vm353_vm0, %v760_v55, %v762_v7  ;;  %786 = vst [vmem:[#allocation5 + $0x10] sm:$0xf] %v782_v13  ;;  %787 = vst [vmem:[#allocation5 + $0x18] sm:$0xf] %v783_v14 }
 0x324   : > { %768 = vst [vmem:[#allocation5 + $0x8] sm:$0xf0] %v764_v11 }
 0x325   : > { %v758_v16 = vpop.permute.xlu1 %757 }
 0x326   : > { %v801_v15 = vpop.permute.xlu0 %800  ;;  %v763_v19 = vsel %vm353_vm0, %v758_v16, %v760_v55 }
 0x327   : > { %v803_v18 = vsel %vm430_vm1, %v799_v57, %v801_v15  ;;  %767 = vst [vmem:[#allocation5] sm:$0xf0] %v763_v19 }
 0x328   : > { %807 = vst [vmem:[#allocation5 + $0x18] sm:$0xf0] %v803_v18 }
 0x329   : > { %v797_v21 = vpop.permute.xlu1 %796 }
 0x32a   : > { %v818_v20 = vpop.permute.xlu0 %817  ;;  %v802_v25 = vsel %vm430_vm1, %v797_v21, %v799_v57 }
 0x32b   : > { %v821_v23 = vsel %vm467_vm2, %v816_v62, %v818_v20  ;;  %v822_v24 = vsel %vm467_vm2, %v818_v20, %v820_v48  ;;  %806 = vst [vmem:[#allocation5 + $0x10] sm:$0xf0] %v802_v25  ;;  %v907_v49 = vld [vmem:[#allocation5 + $0x8] sm:$0xff] }
 0x32c   : > { %825 = vst [vmem:[#allocation5 + $0x20] sm:$0xf] %v821_v23  ;;  %826 = vst [vmem:[#allocation5 + $0x28] sm:$0xf] %v822_v24 }
 0x32d   : > { %v836_v27 = vpop.permute.xlu1 %835 }
 0x32e   : > { %v857_v26 = vpop.permute.xlu0 %856  ;;  %v841_v50 = vsel %vm506_vm13, %v836_v27, %v838_v54  ;;  %v906_v33 = vld [vmem:[#allocation5] sm:$0xff] }
 0x32f   : > { %v860_v28 = vsel %vm544_vm6, %v855_v0, %v857_v26  ;;  %v861_v42 = vsel %vm544_vm6, %v857_v26, %v859_v52  ;;  %v909_v29 = vld [vmem:[#allocation5 + $0x18] sm:$0xff]  ;;  %845 = vst [vmem:[#allocation5 + $0x20] sm:$0xf0] %v841_v50 }
 0x330   : > { %864 = vst [vmem:[#allocation5 + $0x30] sm:$0xf] %v860_v28  ;;  %865 = vst [vmem:[#allocation5 + $0x38] sm:$0xf] %v861_v42  ;;  %v1096_v30 = vpack.c.bf16 %v909_v29, %v907_v49 }
 0x331   : > { %v875_v61 = vpop.permute.xlu1 %874 }
 0x332   : > { %v896_v58 = vpop.permute.xlu0 %895  ;;  %1097 = vmatprep.subr.bf16.mxu1 %v1096_v30  ;;  %v880_v31 = vsel %vm583_vm14, %v875_v61, %v877_v56  ;;  %v908_v32 = vld [vmem:[#allocation5 + $0x10] sm:$0xff] }
 0x333   : > { %884 = vst [vmem:[#allocation5 + $0x30] sm:$0xf0] %v880_v31  ;;  %v1098_v3 = vpack.c.bf16 %v908_v32, %v906_v33  ;;  %v911_v59 = vld [vmem:[#allocation5 + $0x28] sm:$0xff] }
 0x335   : > { %v898_v34 = vpop.permute.xlu1 %897  ;;  %1099 = vmatpush1.bf16.msra.mxu1 %v1098_v3 }
 0x336   : > { %v894_v5 = vpop.permute.xlu0 %893  ;;  %v900_v9 = vsel %vm621_vm7, %v896_v58, %v898_v34  ;;  %v910_v17 = vld [vmem:[#allocation5 + $0x20] sm:$0xff] }
 0x337   : > { %v899_v10 = vsel %vm621_vm7, %v894_v5, %v896_v58  ;;  %v913_v36 = vld [vmem:[#allocation5 + $0x38] sm:$0xff]  ;;  %904 = vst [vmem:[#allocation5 + $0x48] sm:$0xf] %v900_v9 }
 0x338   : > { %903 = vst [vmem:[#allocation5 + $0x40] sm:$0xf] %v899_v10  ;;  %v1100_v37 = vpack.c.bf16 %v913_v36, %v911_v59 }
 0x33a   : > { %1101 = vmatprep.subr.bf16.mxu1 %v1100_v37  ;;  %v912_v39 = vld [vmem:[#allocation5 + $0x30] sm:$0xff] }
 0x33b   : > { %v1102_v4 = vpack.c.bf16 %v912_v39, %v910_v17 }
 0x33d   : > { %1103 = vmatpush1.bf16.msra.mxu1 %v1102_v4 }
 0x33e   : > { %v915_v40 = vld [vmem:[#allocation5 + $0x48] sm:$0xf] }
 0x33f   : > { %1081 = vmatprep.subr.msk.mxu1 %vm649_vm8, %v915_v40  ;;  %v914_v22 = vld [vmem:[#allocation5 + $0x40] sm:$0xf] }
 0x341   : > { %1082 = vmatpush1.msk.msra.mxu1 %vm649_vm8, %v914_v22 }
 0x342   : > { %1083 = vmatmul.mubr.msk.f32.vlgmr.msra.gmra.mrb[0].mxu1 %vm645_vm9, %v905_v60 }
 0x346   : > { %v920_v41 = vpop.permute.xlu1 %919 }
 0x415   : > { %v997_v43 = vpop.f32.mrb[0].mxu1 }
 0x416   : > { %v998_v44 = vadd.f32 %v997_v43, %v920_v41  ;;  %v999_v45 = vpop.f32.mrb[1].mxu1 }
 0x417   : > { %v1000_v46 = vadd.f32 %v999_v45, %v920_v41 }
 0x418   : > { %v1004_v47 = vmul.f32 %v1003_v2, %v998_v44 }
 0x419   : > { %v1005_v38 = vmul.f32 %v1003_v2, %v1000_v46 }
 0x41b   : > { %v1008_v48 = vcombine.low %v1004_v47, %v1005_v38 }
 0x41d   : > { %v1010_v51 = vadd.f32 %v1008_v48, %v1223_v12 }
 0x41f   : > { %1011 = vst [vmem:[%s279_s22] sm:$0xff] %v1010_v51 }
 0x420 PF: > { %s18_s26 = sadd.s32 1, %s1138_s26  }
 0x421   : > { %p15_p4 = scmp.ge.s32.totalorder %s18_s26, 4  }
 0x423   :  { %17 = sbr.rel (!%p15_p4) target bundleno = 2 (0x2), region = 78 }

</bundles_post_ra>
